<compile_context>
chip_gen: v7x
topology: tpu7x:2x2x1
jax: 0.10.0
libtpu: 0.0.40
codegen_flags: <defaults>
</compile_context>

<pallas_src>
import math

import jax
import jax.numpy as jnp
from jax import lax
from jax.experimental import pallas as pl
from jax.experimental.pallas import tpu as pltpu


def _round_up(x, m):
    return ((x + m - 1) // m) * m


def _pick_block(dim, unit, target):
    """Largest multiple of `unit` that divides `dim` and is <= target; else `dim`."""
    if dim % unit != 0 or dim <= unit:
        return dim
    best = unit
    t = unit
    cap = min(dim, max(unit, target))
    while t <= cap:
        if dim % t == 0:
            best = t
        t += unit
    return best


def _make_kernel(tq, tk, num_heads, num_buckets, Sp, G, max_exact, log_ratio):
    span = num_buckets - max_exact

    def kernel(wt_ref, out_ref, ext_ref):
        # wt_ref : (H, B) f32 embedding table (pre-transposed, VMEM resident).
        # out_ref: (H, tq, tk) f32 output block.
        # ext_ref: (H, 8, Sp) f32 scratch -- the pre-sheared bias strip.
        q0 = pl.program_id(0) * tq
        k0 = pl.program_id(1) * tk
        # Largest relative distance represented on sub-row u of the strip is
        # d0 + u; lane s of sub-row u holds distance d0 + u - s (clamped at 0).
        d0 = q0 - k0 + 8 * (G - 1)

        # ---- 1. bucket the (8, Sp) pre-sheared distance strip --------------
        u_io = lax.broadcasted_iota(jnp.int32, (8, Sp), 0)
        s_io = lax.broadcasted_iota(jnp.int32, (8, Sp), 1)
        d = jnp.maximum(d0 + u_io - s_io, 0)              # = max(q - k, 0)
        is_small = d < max_exact
        d_f = jnp.maximum(d, 1).astype(jnp.float32)       # guard log(0); masked below
        # Op-for-op the PyTorch formula (no constant folding -> same rounding).
        large = max_exact + (
            jnp.log(d_f / max_exact) / log_ratio * span).astype(jnp.int32)
        large = jnp.minimum(large, num_buckets - 1)
        bucket = jnp.where(is_small, d, large)            # (8, Sp) int32 in [0, B)

        # ---- 2. gather the strip's bias values (tiny exact one-hot matmuls) -
        b_io = lax.broadcasted_iota(jnp.int32, (num_buckets, 1), 0)
        for u in range(8):                                # static 8-way unroll
            onehot = (bucket[u:u + 1, :] == b_io).astype(jnp.float32)   # (B, Sp)
            ext_ref[:, u, :] = jnp.dot(wt_ref[...], onehot,
                                       preferred_element_type=jnp.float32)

        # ---- 3. Toeplitz expansion: each 8-row group is a contiguous slice --
        for g in range(G):
            r0 = 8 * g
            rows = min(8, tq - r0)
            off = 8 * (G - 1 - g)                         # static lane offset
            out_ref[:, r0:r0 + rows, :] = ext_ref[:, :rows, off:off + tk]

    return kernel


def t5_relative_embeddings(weight, query_length, key_length, max_distance,
                           block_q=None, block_k=None):
    """weight: (num_buckets, num_heads) f32 -> (1, num_heads, Q, K) f32."""
    num_buckets, num_heads = weight.shape
    Q, K = query_length, key_length
    max_exact = num_buckets // 2
    log_ratio = math.log(max_distance / max_exact)

    # --- tile selection: ~4 MiB lane-dense output blocks ---------------------
    elems_target = max(8 * 128, (4 << 20) // (4 * num_heads))
    tk = block_k if block_k is not None else _pick_block(K, 128, 2048)
    tq_target = max(8, min(256, elems_target // max(tk, 1)))
    tq = block_q if block_q is not None else _pick_block(Q, 8, tq_target)
    # Give megacore / v7x's two TensorCores at least two blocks when possible.
    if block_q is None and block_k is None and (Q // tq) * (K // tk) < 2:
        if Q % 8 == 0 and Q >= 16:
            tq = _pick_block(Q, 8, max(8, Q // 2))
        elif K % 128 == 0 and K >= 256:
            tk = _pick_block(K, 128, max(128, K // 2))

    G = pl.cdiv(tq, 8)                        # 8-query-row groups per block
    Sp = _round_up(tk + 8 * (G - 1), 128)     # strip length (lanes)
    grid = (Q // tq, K // tk)

    kernel = _make_kernel(tq, tk, num_heads, num_buckets, Sp, G,
                          max_exact, log_ratio)

    out = pl.pallas_call(
        kernel,
        out_shape=jax.ShapeDtypeStruct((num_heads, Q, K), jnp.float32),
        grid_spec=pltpu.PrefetchScalarGridSpec(
            num_scalar_prefetch=0,
            grid=grid,
            in_specs=[pl.BlockSpec((num_heads, num_buckets),
                                   lambda qi, ki: (0, 0))],       # table resident
            out_specs=pl.BlockSpec((num_heads, tq, tk),
                                   lambda qi, ki: (0, qi, ki)),   # dense (H,tq,tk) slab
            scratch_shapes=[pltpu.VMEM((num_heads, 8, Sp), jnp.float32)]),
        compiler_params=pltpu.CompilerParams(
            dimension_semantics=("parallel", "parallel"),
            vmem_limit_bytes=32 * 1024 * 1024),
        cost_estimate=pl.CostEstimate(
            flops=2 * num_heads * num_buckets * 8 * Sp * grid[0] * grid[1],
            transcendentals=8 * Sp * grid[0] * grid[1],
            bytes_accessed=4 * (num_heads * Q * K + num_buckets * num_heads)),
    )(jnp.transpose(weight))                                      # (H, B)

    # (H, Q, K) -> (1, H, Q, K): metadata-only reshape, no extra HBM traffic.
    return out.reshape(1, num_heads, Q, K)


def _reference(weight, query_length, key_length, max_distance):
    """Pure-JAX reference mirroring the PyTorch forward, for verification."""
    num_buckets, _ = weight.shape
    ctx = jnp.arange(query_length, dtype=jnp.int32)[:, None]
    mem = jnp.arange(key_length, dtype=jnp.int32)[None, :]
    rel = mem - ctx
    rp = -jnp.minimum(rel, 0)
    max_exact = num_buckets // 2
    is_small = rp < max_exact
    rp_large = max_exact + (
        jnp.log(jnp.maximum(rp, 1).astype(jnp.float32) / max_exact)
        / math.log(max_distance / max_exact)
        * (num_buckets - max_exact)
    ).astype(jnp.int32)
    rp_large = jnp.minimum(rp_large, num_buckets - 1)
    bucket = jnp.where(is_small, rp, rp_large)
    values = weight[bucket]                       # (Q, K, H)
    return jnp.transpose(values, (2, 0, 1))[None]


if __name__ == "__main__":
    # Module config (consistent with the PyTorch __init__ shapes).
    num_buckets = 32
    max_distance = 128
    num_heads = 8

    key = jax.random.PRNGKey(0)
    weight = jax.random.normal(key, (num_buckets, num_heads), dtype=jnp.float32)

    configs = [
        (16, 16),     # tiny: full-K block, 2 query blocks, single row group
        (64, 64),     # both bucket branches, multi-group (G=4), 2 query blocks
        (128, 256),   # lane-dense tk=256, G=8, distance clamp at max_distance
    ]
    for (Q, K) in configs:
        out = t5_relative_embeddings(weight, Q, K, max_distance)
        out = jax.block_until_ready(out)
        ref = _reference(weight, Q, K, max_distance)
        assert out.shape == (1, num_heads, Q, K), out.shape
        assert jnp.allclose(out, ref, atol=1e-5), f"mismatch vs reference ({Q}x{K})"

    print("KERNEL_OK")
</pallas_src>

<mosaic_0001>
module attributes {stable_mosaic.version = 11 : i64} {
  func.func @kernel(%arg0: i32, %arg1: i32, %arg2: memref<8x32xf32, #tpu.memory_space<vmem>>, %arg3: memref<8x8x16xf32, #tpu.memory_space<vmem>>, %arg4: memref<8x8x128xf32, #tpu.memory_space<vmem>>) attributes {dimension_semantics = [#tpu.dimension_semantics<parallel>, #tpu.dimension_semantics<parallel>], iteration_bounds = array<i64: 2, 1>, scalar_prefetch = 0 : i64, scratch_operands = 1 : i64, tpu.core_type = #tpu.core_type<tc>, window_params = [{pipeline_mode = #tpu.pipeline_mode<synchronous>, transform_indices = @transform_0, window_bounds = array<i64: 8, 32>}, {transform_indices = @transform_1, window_bounds = array<i64: 8, 8, 16>}]} {
    %c8_i32 = arith.constant 8 : i32
    %0 = arith.muli %arg0, %c8_i32 : i32
    %c16_i32 = arith.constant 16 : i32
    %1 = arith.muli %arg1, %c16_i32 : i32
    %2 = arith.subi %0, %1 : i32
    %c0_i32 = arith.constant 0 : i32
    %3 = arith.addi %2, %c0_i32 : i32
    %4 = tpu.iota {dimensions = array<i32: 0>} : vector<8x128xi32>
    %5 = tpu.iota {dimensions = array<i32: 1>} : vector<8x128xi32>
    %6 = vector.broadcast %3 : i32 to vector<8x128xi32>
    %7 = arith.addi %6, %4 : vector<8x128xi32>
    %8 = arith.subi %7, %5 : vector<8x128xi32>
    %c0_i32_0 = arith.constant 0 : i32
    %9 = vector.broadcast %c0_i32_0 : i32 to vector<8x128xi32>
    %10 = arith.maxsi %8, %9 : vector<8x128xi32>
    %c16_i32_1 = arith.constant 16 : i32
    %11 = vector.broadcast %c16_i32_1 : i32 to vector<8x128xi32>
    %12 = arith.cmpi slt, %10, %11 : vector<8x128xi32>
    %c1_i32 = arith.constant 1 : i32
    %13 = vector.broadcast %c1_i32 : i32 to vector<8x128xi32>
    %14 = arith.maxsi %10, %13 : vector<8x128xi32>
    %15 = arith.sitofp %14 : vector<8x128xi32> to vector<8x128xf32>
    %cst = arith.constant 1.600000e+01 : f32
    %16 = vector.broadcast %cst : f32 to vector<8x128xf32>
    %17 = arith.divf %15, %16 : vector<8x128xf32>
    %18 = math.log %17 : vector<8x128xf32>
    %cst_2 = arith.constant 2.07944155 : f32
    %19 = vector.broadcast %cst_2 : f32 to vector<8x128xf32>
    %20 = arith.divf %18, %19 : vector<8x128xf32>
    %cst_3 = arith.constant 1.600000e+01 : f32
    %21 = vector.broadcast %cst_3 : f32 to vector<8x128xf32>
    %22 = arith.mulf %20, %21 : vector<8x128xf32>
    %23 = arith.fptosi %22 : vector<8x128xf32> to vector<8x128xi32>
    %c16_i32_4 = arith.constant 16 : i32
    %24 = vector.broadcast %c16_i32_4 : i32 to vector<8x128xi32>
    %25 = arith.addi %24, %23 : vector<8x128xi32>
    %c31_i32 = arith.constant 31 : i32
    %26 = vector.broadcast %c31_i32 : i32 to vector<8x128xi32>
    %27 = arith.minsi %25, %26 : vector<8x128xi32>
    %28 = arith.select %12, %10, %27 : vector<8x128xi1>, vector<8x128xi32>
    %29 = tpu.iota {dimensions = array<i32: 0>} : vector<32x1xi32>
    %30 = vector.extract_strided_slice %28 {offsets = [0, 0], sizes = [1, 128], strides = [1, 1]} : vector<8x128xi32> to vector<1x128xi32>
    %31 = vector.broadcast %30 : vector<1x128xi32> to vector<32x128xi32>
    %32 = vector.broadcast %29 : vector<32x1xi32> to vector<32x128xi32>
    %33 = arith.cmpi eq, %31, %32 : vector<32x128xi32>
    %34 = arith.extui %33 : vector<32x128xi1> to vector<32x128xi32>
    %35 = arith.sitofp %34 : vector<32x128xi32> to vector<32x128xf32>
    %c0 = arith.constant 0 : index
    %c0_5 = arith.constant 0 : index
    %36 = vector.load %arg2[%c0, %c0_5] : memref<8x32xf32, #tpu.memory_space<vmem>>, vector<8x32xf32>
    %cst_6 = arith.constant dense<0.000000e+00> : vector<8x128xf32>
    %37 = tpu.matmul %36, %35, %cst_6 {dimension_numbers = #tpu.dot_dimension_numbers<[1], [0], [0], [1], [0, 0, 1, 1], [], []>} : vector<8x32xf32>, vector<32x128xf32>, vector<8x128xf32> -> vector<8x128xf32>
    %c0_7 = arith.constant 0 : index
    %c0_8 = arith.constant 0 : index
    %c0_9 = arith.constant 0 : index
    %38 = vector.load %arg4[%c0_7, %c0_8, %c0_9] : memref<8x8x128xf32, #tpu.memory_space<vmem>>, vector<8x1x128xf32>
    %39 = vector.shape_cast %38 : vector<8x1x128xf32> to vector<8x128xf32>
    %40 = vector.shape_cast %37 : vector<8x128xf32> to vector<8x1x128xf32>
    tpu.vector_store %arg4[%c0_7, %c0_8, %c0_9], %40 {strides = array<i32>} : memref<8x8x128xf32, #tpu.memory_space<vmem>>, vector<8x1x128xf32>,
    %41 = vector.extract_strided_slice %28 {offsets = [1, 0], sizes = [1, 128], strides = [1, 1]} : vector<8x128xi32> to vector<1x128xi32>
    %42 = vector.broadcast %41 : vector<1x128xi32> to vector<32x128xi32>
    %43 = vector.broadcast %29 : vector<32x1xi32> to vector<32x128xi32>
    %44 = arith.cmpi eq, %42, %43 : vector<32x128xi32>
    %45 = arith.extui %44 : vector<32x128xi1> to vector<32x128xi32>
    %46 = arith.sitofp %45 : vector<32x128xi32> to vector<32x128xf32>
    %c0_10 = arith.constant 0 : index
    %c0_11 = arith.constant 0 : index
    %47 = vector.load %arg2[%c0_10, %c0_11] : memref<8x32xf32, #tpu.memory_space<vmem>>, vector<8x32xf32>
    %cst_12 = arith.constant dense<0.000000e+00> : vector<8x128xf32>
    %48 = tpu.matmul %47, %46, %cst_12 {dimension_numbers = #tpu.dot_dimension_numbers<[1], [0], [0], [1], [0, 0, 1, 1], [], []>} : vector<8x32xf32>, vector<32x128xf32>, vector<8x128xf32> -> vector<8x128xf32>
    %c0_13 = arith.constant 0 : index
    %c1 = arith.constant 1 : index
    %c0_14 = arith.constant 0 : index
    %49 = vector.load %arg4[%c0_13, %c1, %c0_14] : memref<8x8x128xf32, #tpu.memory_space<vmem>>, vector<8x1x128xf32>
    %50 = vector.shape_cast %49 : vector<8x1x128xf32> to vector<8x128xf32>
    %51 = vector.shape_cast %48 : vector<8x128xf32> to vector<8x1x128xf32>
    tpu.vector_store %arg4[%c0_13, %c1, %c0_14], %51 {strides = array<i32>} : memref<8x8x128xf32, #tpu.memory_space<vmem>>, vector<8x1x128xf32>,
    %52 = vector.extract_strided_slice %28 {offsets = [2, 0], sizes = [1, 128], strides = [1, 1]} : vector<8x128xi32> to vector<1x128xi32>
    %53 = vector.broadcast %52 : vector<1x128xi32> to vector<32x128xi32>
    %54 = vector.broadcast %29 : vector<32x1xi32> to vector<32x128xi32>
    %55 = arith.cmpi eq, %53, %54 : vector<32x128xi32>
    %56 = arith.extui %55 : vector<32x128xi1> to vector<32x128xi32>
    %57 = arith.sitofp %56 : vector<32x128xi32> to vector<32x128xf32>
    %c0_15 = arith.constant 0 : index
    %c0_16 = arith.constant 0 : index
    %58 = vector.load %arg2[%c0_15, %c0_16] : memref<8x32xf32, #tpu.memory_space<vmem>>, vector<8x32xf32>
    %cst_17 = arith.constant dense<0.000000e+00> : vector<8x128xf32>
    %59 = tpu.matmul %58, %57, %cst_17 {dimension_numbers = #tpu.dot_dimension_numbers<[1], [0], [0], [1], [0, 0, 1, 1], [], []>} : vector<8x32xf32>, vector<32x128xf32>, vector<8x128xf32> -> vector<8x128xf32>
    %c0_18 = arith.constant 0 : index
    %c2 = arith.constant 2 : index
    %c0_19 = arith.constant 0 : index
    %60 = vector.load %arg4[%c0_18, %c2, %c0_19] : memref<8x8x128xf32, #tpu.memory_space<vmem>>, vector<8x1x128xf32>
    %61 = vector.shape_cast %60 : vector<8x1x128xf32> to vector<8x128xf32>
    %62 = vector.shape_cast %59 : vector<8x128xf32> to vector<8x1x128xf32>
    tpu.vector_store %arg4[%c0_18, %c2, %c0_19], %62 {strides = array<i32>} : memref<8x8x128xf32, #tpu.memory_space<vmem>>, vector<8x1x128xf32>,
    %63 = vector.extract_strided_slice %28 {offsets = [3, 0], sizes = [1, 128], strides = [1, 1]} : vector<8x128xi32> to vector<1x128xi32>
    %64 = vector.broadcast %63 : vector<1x128xi32> to vector<32x128xi32>
    %65 = vector.broadcast %29 : vector<32x1xi32> to vector<32x128xi32>
    %66 = arith.cmpi eq, %64, %65 : vector<32x128xi32>
    %67 = arith.extui %66 : vector<32x128xi1> to vector<32x128xi32>
    %68 = arith.sitofp %67 : vector<32x128xi32> to vector<32x128xf32>
    %c0_20 = arith.constant 0 : index
    %c0_21 = arith.constant 0 : index
    %69 = vector.load %arg2[%c0_20, %c0_21] : memref<8x32xf32, #tpu.memory_space<vmem>>, vector<8x32xf32>
    %cst_22 = arith.constant dense<0.000000e+00> : vector<8x128xf32>
    %70 = tpu.matmul %69, %68, %cst_22 {dimension_numbers = #tpu.dot_dimension_numbers<[1], [0], [0], [1], [0, 0, 1, 1], [], []>} : vector<8x32xf32>, vector<32x128xf32>, vector<8x128xf32> -> vector<8x128xf32>
    %c0_23 = arith.constant 0 : index
    %c3 = arith.constant 3 : index
    %c0_24 = arith.constant 0 : index
    %71 = vector.load %arg4[%c0_23, %c3, %c0_24] : memref<8x8x128xf32, #tpu.memory_space<vmem>>, vector<8x1x128xf32>
    %72 = vector.shape_cast %71 : vector<8x1x128xf32> to vector<8x128xf32>
    %73 = vector.shape_cast %70 : vector<8x128xf32> to vector<8x1x128xf32>
    tpu.vector_store %arg4[%c0_23, %c3, %c0_24], %73 {strides = array<i32>} : memref<8x8x128xf32, #tpu.memory_space<vmem>>, vector<8x1x128xf32>,
    %74 = vector.extract_strided_slice %28 {offsets = [4, 0], sizes = [1, 128], strides = [1, 1]} : vector<8x128xi32> to vector<1x128xi32>
    %75 = vector.broadcast %74 : vector<1x128xi32> to vector<32x128xi32>
    %76 = vector.broadcast %29 : vector<32x1xi32> to vector<32x128xi32>
    %77 = arith.cmpi eq, %75, %76 : vector<32x128xi32>
    %78 = arith.extui %77 : vector<32x128xi1> to vector<32x128xi32>
    %79 = arith.sitofp %78 : vector<32x128xi32> to vector<32x128xf32>
    %c0_25 = arith.constant 0 : index
    %c0_26 = arith.constant 0 : index
    %80 = vector.load %arg2[%c0_25, %c0_26] : memref<8x32xf32, #tpu.memory_space<vmem>>, vector<8x32xf32>
    %cst_27 = arith.constant dense<0.000000e+00> : vector<8x128xf32>
    %81 = tpu.matmul %80, %79, %cst_27 {dimension_numbers = #tpu.dot_dimension_numbers<[1], [0], [0], [1], [0, 0, 1, 1], [], []>} : vector<8x32xf32>, vector<32x128xf32>, vector<8x128xf32> -> vector<8x128xf32>
    %c0_28 = arith.constant 0 : index
    %c4 = arith.constant 4 : index
    %c0_29 = arith.constant 0 : index
    %82 = vector.load %arg4[%c0_28, %c4, %c0_29] : memref<8x8x128xf32, #tpu.memory_space<vmem>>, vector<8x1x128xf32>
    %83 = vector.shape_cast %82 : vector<8x1x128xf32> to vector<8x128xf32>
    %84 = vector.shape_cast %81 : vector<8x128xf32> to vector<8x1x128xf32>
    tpu.vector_store %arg4[%c0_28, %c4, %c0_29], %84 {strides = array<i32>} : memref<8x8x128xf32, #tpu.memory_space<vmem>>, vector<8x1x128xf32>,
    %85 = vector.extract_strided_slice %28 {offsets = [5, 0], sizes = [1, 128], strides = [1, 1]} : vector<8x128xi32> to vector<1x128xi32>
    %86 = vector.broadcast %85 : vector<1x128xi32> to vector<32x128xi32>
    %87 = vector.broadcast %29 : vector<32x1xi32> to vector<32x128xi32>
    %88 = arith.cmpi eq, %86, %87 : vector<32x128xi32>
    %89 = arith.extui %88 : vector<32x128xi1> to vector<32x128xi32>
    %90 = arith.sitofp %89 : vector<32x128xi32> to vector<32x128xf32>
    %c0_30 = arith.constant 0 : index
    %c0_31 = arith.constant 0 : index
    %91 = vector.load %arg2[%c0_30, %c0_31] : memref<8x32xf32, #tpu.memory_space<vmem>>, vector<8x32xf32>
    %cst_32 = arith.constant dense<0.000000e+00> : vector<8x128xf32>
    %92 = tpu.matmul %91, %90, %cst_32 {dimension_numbers = #tpu.dot_dimension_numbers<[1], [0], [0], [1], [0, 0, 1, 1], [], []>} : vector<8x32xf32>, vector<32x128xf32>, vector<8x128xf32> -> vector<8x128xf32>
    %c0_33 = arith.constant 0 : index
    %c5 = arith.constant 5 : index
    %c0_34 = arith.constant 0 : index
    %93 = vector.load %arg4[%c0_33, %c5, %c0_34] : memref<8x8x128xf32, #tpu.memory_space<vmem>>, vector<8x1x128xf32>
    %94 = vector.shape_cast %93 : vector<8x1x128xf32> to vector<8x128xf32>
    %95 = vector.shape_cast %92 : vector<8x128xf32> to vector<8x1x128xf32>
    tpu.vector_store %arg4[%c0_33, %c5, %c0_34], %95 {strides = array<i32>} : memref<8x8x128xf32, #tpu.memory_space<vmem>>, vector<8x1x128xf32>,
    %96 = vector.extract_strided_slice %28 {offsets = [6, 0], sizes = [1, 128], strides = [1, 1]} : vector<8x128xi32> to vector<1x128xi32>
    %97 = vector.broadcast %96 : vector<1x128xi32> to vector<32x128xi32>
    %98 = vector.broadcast %29 : vector<32x1xi32> to vector<32x128xi32>
    %99 = arith.cmpi eq, %97, %98 : vector<32x128xi32>
    %100 = arith.extui %99 : vector<32x128xi1> to vector<32x128xi32>
    %101 = arith.sitofp %100 : vector<32x128xi32> to vector<32x128xf32>
    %c0_35 = arith.constant 0 : index
    %c0_36 = arith.constant 0 : index
    %102 = vector.load %arg2[%c0_35, %c0_36] : memref<8x32xf32, #tpu.memory_space<vmem>>, vector<8x32xf32>
    %cst_37 = arith.constant dense<0.000000e+00> : vector<8x128xf32>
    %103 = tpu.matmul %102, %101, %cst_37 {dimension_numbers = #tpu.dot_dimension_numbers<[1], [0], [0], [1], [0, 0, 1, 1], [], []>} : vector<8x32xf32>, vector<32x128xf32>, vector<8x128xf32> -> vector<8x128xf32>
    %c0_38 = arith.constant 0 : index
    %c6 = arith.constant 6 : index
    %c0_39 = arith.constant 0 : index
    %104 = vector.load %arg4[%c0_38, %c6, %c0_39] : memref<8x8x128xf32, #tpu.memory_space<vmem>>, vector<8x1x128xf32>
    %105 = vector.shape_cast %104 : vector<8x1x128xf32> to vector<8x128xf32>
    %106 = vector.shape_cast %103 : vector<8x128xf32> to vector<8x1x128xf32>
    tpu.vector_store %arg4[%c0_38, %c6, %c0_39], %106 {strides = array<i32>} : memref<8x8x128xf32, #tpu.memory_space<vmem>>, vector<8x1x128xf32>,
    %107 = vector.extract_strided_slice %28 {offsets = [7, 0], sizes = [1, 128], strides = [1, 1]} : vector<8x128xi32> to vector<1x128xi32>
    %108 = vector.broadcast %107 : vector<1x128xi32> to vector<32x128xi32>
    %109 = vector.broadcast %29 : vector<32x1xi32> to vector<32x128xi32>
    %110 = arith.cmpi eq, %108, %109 : vector<32x128xi32>
    %111 = arith.extui %110 : vector<32x128xi1> to vector<32x128xi32>
    %112 = arith.sitofp %111 : vector<32x128xi32> to vector<32x128xf32>
    %c0_40 = arith.constant 0 : index
    %c0_41 = arith.constant 0 : index
    %113 = vector.load %arg2[%c0_40, %c0_41] : memref<8x32xf32, #tpu.memory_space<vmem>>, vector<8x32xf32>
    %cst_42 = arith.constant dense<0.000000e+00> : vector<8x128xf32>
    %114 = tpu.matmul %113, %112, %cst_42 {dimension_numbers = #tpu.dot_dimension_numbers<[1], [0], [0], [1], [0, 0, 1, 1], [], []>} : vector<8x32xf32>, vector<32x128xf32>, vector<8x128xf32> -> vector<8x128xf32>
    %c0_43 = arith.constant 0 : index
    %c7 = arith.constant 7 : index
    %c0_44 = arith.constant 0 : index
    %115 = vector.load %arg4[%c0_43, %c7, %c0_44] : memref<8x8x128xf32, #tpu.memory_space<vmem>>, vector<8x1x128xf32>
    %116 = vector.shape_cast %115 : vector<8x1x128xf32> to vector<8x128xf32>
    %117 = vector.shape_cast %114 : vector<8x128xf32> to vector<8x1x128xf32>
    tpu.vector_store %arg4[%c0_43, %c7, %c0_44], %117 {strides = array<i32>} : memref<8x8x128xf32, #tpu.memory_space<vmem>>, vector<8x1x128xf32>,
    %c0_45 = arith.constant 0 : index
    %c0_46 = arith.constant 0 : index
    %c0_47 = arith.constant 0 : index
    %118 = vector.load %arg4[%c0_45, %c0_46, %c0_47] : memref<8x8x128xf32, #tpu.memory_space<vmem>>, vector<8x8x16xf32>
    %c0_48 = arith.constant 0 : index
    %c0_49 = arith.constant 0 : index
    %c0_50 = arith.constant 0 : index
    %119 = vector.load %arg3[%c0_48, %c0_49, %c0_50] : memref<8x8x16xf32, #tpu.memory_space<vmem>>, vector<8x8x16xf32>
    tpu.vector_store %arg3[%c0_48, %c0_49, %c0_50], %118 {strides = array<i32>} : memref<8x8x16xf32, #tpu.memory_space<vmem>>, vector<8x8x16xf32>,
    return
  }
  func.func @transform_0(%arg0: i32, %arg1: i32) -> (i32, i32) {
    %c0_i32 = arith.constant 0 : i32
    %c0_i32_0 = arith.constant 0 : i32
    %c0_i32_1 = arith.constant 0 : i32
    return %c0_i32, %c0_i32_0 : i32, i32
  }
  func.func @transform_1(%arg0: i32, %arg1: i32) -> (i32, i32, i32) {
    %c0_i32 = arith.constant 0 : i32
    %c0_i32_0 = arith.constant 0 : i32
    return %c0_i32, %arg0, %arg1 : i32, i32, i32
  }
}

</mosaic_0001>

<bundles_post_ra>
// kernel: tpu_custom_call.1
= control target key start
LH: loop header
LB: loop body
LE: loop exit
PB: predicated region body
PF: predicated region fallthrough
CT: control target
= control target key end

     0   :  { %6 = vsyncpa [#allocation4], 0  ;;  %s2346_s0 = inlined_call_operand.hbm [shape: f32[8,32], index: 0, kind: input, shape index: {}]   ;;  %s2347_s1 = inlined_call_operand.hbm [shape: f32[8,16,16], index: 1, kind: output, shape index: {}]  }
   0x1   :  { %7 = vsyncpa [#allocation5], 0 }
   0x2   :  { %9 = vsyncpa [#allocation5 + $0x1], 0  ;;  %s2006_s6 = smov 0   ;;  %s2008_s7 = smov 0  }
   0x3   :  { %s2010_s8 = smov 0   ;;  %s2012_s9 = smov 0  }
   0x4   :  { %s2014_s10 = smov 0   ;;  %s2016_s11 = smov 0  }
   0x5 LB: > { %s1504_s12 = sadd.s32 4294967295, %s1984_s11   ;;  %s1505_s13 = sadd.s32 4294967294, %s1984_s11   ;;  %s1984_s11 = sphi %s2016_s11, %s15_s11   ;;  %s1980_s10 = sphi %s2014_s10, %s2365_s10   ;;  %s1976_s9 = sphi %s2012_s9, %s2364_s9   ;;  %s1972_s8 = sphi %s2010_s8, %s2363_s8   ;;  %s1968_s7 = sphi %s2008_s7, %s2362_s7   ;;  %s1964_s6 = sphi %s2006_s6, %s2361_s6  }
   0x6   : > { %s27_s14 = sadd.s32 1, %s1980_s10  ;;  %s57_s15 = sadd.s32 1, %s1972_s8 }
   0x7   : > { %p29_p0 = scmp.ge.s32.totalorder %s27_s14, 2  ;;  %p67_p1 = scmp.ne.s32.totalorder %s1972_s8, %s1968_s7 }
   0x8   : > { %p68_p2 = scmp.eq.s32.totalorder %s1504_s12, 1  ;;  %p73_p3 = scmp.ne.s32.totalorder %s1968_s7, %s1964_s6 }
   0x9   : > { %s2367_s14 = smov (%p29_p0, %s27_s14), 0  ;;  %p74_p5 = scmp.eq.s32.totalorder %s1505_s13, 1 }
   0xa   : > { %p2046_p4 = por %p68_p2, %p67_p1  ;;  %s52_s17 = ssub.s32 %s1980_s10, %s2367_s14 }
   0xb   : > { %p1506_p6 = scmp.ge.s32.totalorder %s1984_s11, 1  ;;  %p55_p7 = scmp.eq.s32.totalorder %s52_s17, 0 }
   0xc   : > { %s2352_s16 = scalar_select %p2046_p4, 1, 0 }
   0xd   : > { %p2053_p8 = por %p74_p5, %p73_p3  ;;  %p81_p9 = scmp.lt.s32.totalorder %s1984_s11, 3 }
   0xe   : > { %s2059_s19 = scalar_select %p55_p7, %s1972_s8, %s57_s15  }
   0xf   : > { %s2353_s18 = scalar_select %p2053_p8, 1, 0 }
  0x10   : > { %p2061_p10 = pnand %p1506_p6, %p81_p9  ;;  %p2065_p11 = scmp.eq.s32.totalorder %s1504_s12, 0 }
  0x11   : > { %s1986_s22 = smov [#allocation3]   ;;  %s1874_s27 = scalar_lea.hbm %s2346_s0, 128 }
  0x12   : > { %s2354_s20 = scalar_select %p2061_p10, 1, 0 }
  0x13   : > { %s2355_s21 = scalar_select %p2065_p11, 1, 0 }
  0x14   : > { %p1804_p12 = pneg %p2061_p10  ;;  %s94_s23 = sshll.u32 %s1986_s22, 4  ;;  %s95_s23 = int_to_ptr.vmem [resolvable:$true] %s94_s23 }
  0x15   : > { %p1875_p0 = scmp.ne.s32.totalorder %s2346_s0, %s1874_s27  ;;  %p1881_p5 = scmp.lt.u32.totalorder %s1874_s27, %s2346_s0 }
  0x16   : > { %p2073_p13 = pnand %p2065_p11, %p1804_p12 }
  0x18   : > { %p1876_p1 = pneg %p2073_p13 }
  0x1a   : > { %p1877_p2 = pnand %p1876_p1, %p1875_p0 }
  0x1c   : > { %p1878_p3 = pneg %p1877_p2 }
  0x1e   : > { %p1883_p6 = pnand %p1881_p5, %p1878_p3 }
  0x20   : > { %1886 = shalt.err (!%p1883_p6)
}
  0x21   : > { %s1887_s3 = scalar_lea.vmem %s95_s23, 128  ;;  %p1895_p8 = scmp.lt.s32.totalorder %s95_s23, %s95_s23 }
  0x22   : > { %p1888_p7 = scmp.ne.s32.totalorder %s95_s23, %s1887_s3  ;;  %p1896_p4 = scmp.lt.s32.totalorder %s1887_s3, %s1887_s3 }
  0x24   : > { %p1890_p9 = pnand %p1888_p7, %p1876_p1  ;;  %p1897_p11 = por %p1896_p4, %p1895_p8 }
  0x26   : > { %p1891_p12 = pneg %p1890_p9 }
  0x28   : > { %p1898_p10 = pnand %p1897_p11, %p1891_p12 }
  0x2a   : > { %1901 = shalt.err (!%p1898_p10)
}
  0x2b   : > { %1807 = dma.hbm_to_vmem [thread:$0]  (!%p2073_p13), %s2346_s0, 128, %s95_s23, [#allocation4]  }
  0x2c   : > { %p2357_p0 = scmp.ne.s32.totalorder %s2354_s20, 0 }
  0x2d   : > { %p2358_p2 = scmp.ne.s32.totalorder (!%p2357_p0), %s2355_s21, 0 }
  0x2e   : > { %107 = sbr.rel (%p2357_p0) target bundleno = 382 (0x17e), region = 24 }
  0x35   : > { %1955 = dma.done.wait (%p2358_p2), [#allocation4], 128  }
  0x36   : > { %1957 = vsyncadd (%p2358_p2), [#allocation4], 4294967168  ;;  %s1511_s12 = sshll.u32 %s1976_s9, 3  ;;  %v125_v0 = vlaneseq  ;;  %v1987_v1 = vmov 0.0|0.0   ;;  %vm1988_vm0 = vmmov 0   ;;  %v1989_v5 = vmov 0.0  }
  0x37   : > { %1748 = vmatprep.subr.bf16.mxu0 %v1987_v1  ;;  %1754 = vmatprep.subr.bf16.mxu1 %v1987_v1  ;;  %v129_v2 = vstv %s1511_s12  ;;  %v1990_v32 = vmov 1.0|1.0   ;;  %v2147_v35 = vld [vmem:[#allocation3] sm:$0xff]  ;;  %v1991_v42 = vmov 1966171168   ;;  %s119_s13 = sand.u32 1, %s1968_s7  }
  0x38   : > { %v2102_v3 = vshrl.u32 %v125_v0, 7  ;;  %v128_v4 = vand.u32 127, %v125_v0  ;;  %1668 = vmatprep.mubr.msk.f32.mxu0 %vm1988_vm0, %v1989_v5  ;;  %1679 = vmatprep.mubr.msk.f32.mxu1 %vm1988_vm0, %v1989_v5  ;;  %v247_v43 = vunpack.c.l.s4 %v1991_v42  ;;  %s1510_s15 = sshll.u32 %s119_s13, 6  ;;  %s1617_s20 = sshll.u32 %s1976_s9, 7 }
  0x39   : > { %s121_s17 = scalar_lea.vmem [#allocation6], %s1510_s15  ;;  %s2291_s24 = scalar_lea.hbm %s2347_s1, %s1617_s20 }
  0x3a   : > { %v130_v6 = vadd.s32 %v129_v2, %v2102_v3  ;;  %v155_v19 = vsub.s32 0, %v2102_v3  ;;  %v312_v20 = vsub.s32 1, %v2102_v3  ;;  %v468_v21 = vsub.s32 2, %v2102_v3  ;;  %s1433_s21 = sshll.u32 %s121_s17, 4  ;;  %s2300_s9 = scalar_lea.sflag [#allocation5], %s119_s13  ;;  %s2293_s21 = int_to_ptr.vmem [resolvable:$true] %s1433_s21 }
  0x3b   : > { %v624_v22 = vsub.s32 3, %v2102_v3  ;;  %v2114_v24 = vadd.s32 8, %v2102_v3  ;;  %v2119_v26 = vadd.s32 16, %v2102_v3  ;;  %v2122_v27 = vadd.s32 24, %v2102_v3  ;;  %s1902_s25 = scalar_lea.vmem %s2293_s21, 1024  ;;  %p2359_p8 = scmp.ne.s32.totalorder %s2352_s16, 0 }
  0x3c   : > { %v131_v7 = vsub.s32 %v130_v6, %v128_v4  ;;  %v780_v33 = vsub.s32 4, %v2102_v3  ;;  %v936_v34 = vsub.s32 5, %v2102_v3  ;;  %v1092_v38 = vsub.s32 6, %v2102_v3  ;;  %p1903_p4 = scmp.ne.s32.totalorder %s2293_s21, %s1902_s25  ;;  %s1992_s26 = smov [#allocation6]  }
  0x3d   : > { %v1248_v39 = vsub.s32 7, %v2102_v3  ;;  %v248_v44 = vunpack.c.0.s8 %v247_v43  ;;  %s1906_s27 = sshll.u32 %s1992_s26, 4  ;;  %s1907_s27 = int_to_ptr.vmem [resolvable:$false] %s1906_s27 }
  0x3e   : > { %vm132_vm1 = vcmp.gt.s32.totalorder %v131_v7, 0  ;;  %p1904_p10 = pnand %p1903_p4, %p2359_p8  ;;  %s1908_s28 = scalar_lea.vmem %s1907_s27, 2048 }
  0x3f   : > { %v133_v8 = vsel %vm132_vm1, %v131_v7, 0  ;;  %v2229_v45 = vsub.s32 %v248_v44, %v2102_v3  ;;  %p1909_p13 = scmp.lt.s32.totalorder %s2293_s21, %s1907_s27  ;;  %p1910_p1 = scmp.lt.s32.totalorder %s1908_s28, %s1902_s25 }
  0x40   : > { %vm135_vm2 = vcmp.gt.s32.totalorder %v133_v8, 1  ;;  %vm134_vm3 = vcmp.lt.s32.totalorder %v133_v8, 16  ;;  %p1905_p11 = pneg %p1904_p10 }
  0x41   : > { %v136_v9 = vsel %vm135_vm2, %v133_v8, 1  ;;  %p1911_p3 = por %p1910_p1, %p1909_p13 }
  0x42   : > { %v137_v10 = vcvt.s32.f32 %v136_v9 }
  0x43   : > { %p1912_p5 = pnand %p1911_p3, %p1905_p11 }
  0x44   : > { %v139_v11 = vmul.f32 0.0625, %v137_v10 }
  0x46   : > { %1872 = vlog2.f32 %v139_v11 }
  0x50   : > { %v1873_v12 = vpop.eup %1872 }
  0x51   : > { %v141_v13 = vmul.f32 0.6931472, %v1873_v12 }
  0x53   : > { %v143_v14 = vmul.f32 0.48089835, %v141_v13 }
  0x55   : > { %v144_v15 = vmul.f32 16.0, %v143_v14 }
  0x57   : > { %v1796_v16 = vtrunc.f32 %v144_v15 }
  0x59   : > { %v1797_v17 = vcvt.f32.s32 %v1796_v16 }
  0x5b   : > { %v146_v18 = vadd.s32 16, %v1797_v17 }
  0x5d   : > { %vm147_vm4 = vcmp.lt.s32.totalorder %v146_v18, 31 }
  0x5e   : > { %v148_v23 = vsel %vm147_vm4, %v146_v18, 31 }
  0x5f   : > { %v2116_v25 = vsel %vm134_vm3, %v133_v8, %v148_v23 }
  0x60   : > { %v156_v28 = vrot.slane %v2116_v25, %v155_v19  ;;  %v313_v29 = vrot.slane %v2116_v25, %v312_v20  ;;  %v469_v30 = vrot.slane %v2116_v25, %v468_v21  ;;  %v625_v31 = vrot.slane %v2116_v25, %v624_v22 }
  0x61   : > { %v781_v36 = vrot.slane %v2116_v25, %v780_v33  ;;  %v937_v37 = vrot.slane %v2116_v25, %v936_v34  ;;  %v1093_v40 = vrot.slane %v2116_v25, %v1092_v38  ;;  %v1249_v41 = vrot.slane %v2116_v25, %v1248_v39 }
  0x62   : > { %vm157_vm5 = vcmp.eq.s32.totalorder %v156_v28, %v2102_v3  ;;  %vm158_vm6 = vcmp.eq.s32.totalorder %v156_v28, %v2114_v24  ;;  %vm314_vm7 = vcmp.eq.s32.totalorder %v313_v29, %v2102_v3  ;;  %vm315_vm8 = vcmp.eq.s32.totalorder %v313_v29, %v2114_v24 }
  0x63   : > { %vm1749_vm9 = vmpackc.low %vm158_vm6, %vm157_vm5  ;;  %vm159_vm10 = vcmp.eq.s32.totalorder %v156_v28, %v2119_v26  ;;  %vm160_vm11 = vcmp.eq.s32.totalorder %v156_v28, %v2122_v27  ;;  %vm316_vm12 = vcmp.eq.s32.totalorder %v313_v29, %v2119_v26  ;;  %vm317_vm13 = vcmp.eq.s32.totalorder %v313_v29, %v2122_v27 }
  0x64   : > { %1750 = vmatpush3.bf16.msk.msra.mxu0 %vm1749_vm9, %v1990_v32  ;;  %vm1755_vm14 = vmpackc.low %vm315_vm8, %vm314_vm7  ;;  %vm470_vm2 = vcmp.eq.s32.totalorder %v469_v30, %v2102_v3  ;;  %vm471_vm3 = vcmp.eq.s32.totalorder %v469_v30, %v2114_v24  ;;  %vm626_vm4 = vcmp.eq.s32.totalorder %v625_v31, %v2102_v3  ;;  %vm627_vm5 = vcmp.eq.s32.totalorder %v625_v31, %v2114_v24 }
  0x65   : > { %1756 = vmatpush3.bf16.msk.msra.mxu1 %vm1755_vm14, %v1990_v32  ;;  %1751 = vmatprep.subr.bf16.mxu0 %v1987_v1  ;;  %vm1752_vm15 = vmpackc.low %vm160_vm11, %vm159_vm10  ;;  %vm170_vm6 = vcmask 261120   ;;  %vm472_vm9 = vcmp.eq.s32.totalorder %v469_v30, %v2119_v26  ;;  %vm473_vm10 = vcmp.eq.s32.totalorder %v469_v30, %v2122_v27  ;;  %vm628_vm11 = vcmp.eq.s32.totalorder %v625_v31, %v2119_v26 }
  0x66   : > { %1757 = vmatprep.subr.bf16.mxu1 %v1987_v1  ;;  %vm1758_vm1 = vmpackc.low %vm317_vm13, %vm316_vm12  ;;  %vm629_vm12 = vcmp.eq.s32.totalorder %v625_v31, %v2122_v27 }
  0x67   : > { %vm1761_vm7 = vmpackc.low %vm471_vm3, %vm470_vm2  ;;  %vm938_vm2 = vcmp.eq.s32.totalorder %v937_v37, %v2102_v3  ;;  %vm939_vm3 = vcmp.eq.s32.totalorder %v937_v37, %v2114_v24 }
  0x68   : > { %1753 = vmatpush3.bf16.msk.msra.mxu0 %vm1752_vm15, %v1990_v32  ;;  %vm1767_vm8 = vmpackc.low %vm627_vm5, %vm626_vm4  ;;  %vm782_vm15 = vcmp.eq.s32.totalorder %v781_v36, %v2102_v3 }
  0x69   : > { %1759 = vmatpush3.bf16.msk.msra.mxu1 %vm1758_vm1, %v1990_v32  ;;  %1760 = vmatprep.subr.bf16.mxu0 %v1987_v1  ;;  %vm1764_vm13 = vmpackc.low %vm473_vm10, %vm472_vm9  ;;  %vm783_vm1 = vcmp.eq.s32.totalorder %v781_v36, %v2114_v24  ;;  %vm940_vm9 = vcmp.eq.s32.totalorder %v937_v37, %v2119_v26  ;;  %vm941_vm10 = vcmp.eq.s32.totalorder %v937_v37, %v2122_v27 }
  0x6a   : > { %1766 = vmatprep.subr.bf16.mxu1 %v1987_v1  ;;  %vm1770_vm14 = vmpackc.low %vm629_vm12, %vm628_vm11 }
  0x6b   : > { %1669 = vmatmul.mubr.msk.f32.vlgmr.msra.gmra.mrb[0].mxu0 %vm170_vm6, %v2147_v35  ;;  %vm1773_vm4 = vmpackc.low %vm783_vm1, %vm782_vm15  ;;  %vm1250_vm15 = vcmp.eq.s32.totalorder %v1249_v41, %v2102_v3  ;;  %vm1251_vm1 = vcmp.eq.s32.totalorder %v1249_v41, %v2114_v24 }
  0x6c   : > { %1680 = vmatmul.mubr.msk.f32.vlgmr.msra.gmra.mrb[0].mxu1 %vm170_vm6, %v2147_v35  ;;  %1762 = vmatpush3.bf16.msk.msra.mxu0 %vm1761_vm7, %v1990_v32  ;;  %vm1779_vm5 = vmpackc.low %vm939_vm3, %vm938_vm2  ;;  %vm784_vm7 = vcmp.eq.s32.totalorder %v781_v36, %v2119_v26 }
  0x6d   : > { %1768 = vmatpush3.bf16.msk.msra.mxu1 %vm1767_vm8, %v1990_v32  ;;  %1763 = vmatprep.subr.bf16.mxu0 %v1987_v1  ;;  %vm785_vm8 = vcmp.eq.s32.totalorder %v781_v36, %v2122_v27  ;;  %vm1782_vm12 = vmpackc.low %vm941_vm10, %vm940_vm9 }
  0x6e   : > { %1769 = vmatprep.subr.bf16.mxu1 %v1987_v1  ;;  %1690 = vmatprep.mubr.msk.f32.mxu0 %vm1988_vm0, %v1989_v5  ;;  %vm1776_vm11 = vmpackc.low %vm785_vm8, %vm784_vm7  ;;  %vm1252_vm7 = vcmp.eq.s32.totalorder %v1249_v41, %v2119_v26  ;;  %vm1253_vm8 = vcmp.eq.s32.totalorder %v1249_v41, %v2122_v27 }
  0x6f   : > { %1701 = vmatprep.mubr.msk.f32.mxu1 %vm1988_vm0, %v1989_v5  ;;  %vm1791_vm3 = vmpackc.low %vm1251_vm1, %vm1250_vm15 }
  0x70   : > { %1765 = vmatpush3.bf16.msk.msra.mxu0 %vm1764_vm13, %v1990_v32  ;;  %vm1094_vm13 = vcmp.eq.s32.totalorder %v1093_v40, %v2102_v3  ;;  %vm1794_vm10 = vmpackc.low %vm1253_vm8, %vm1252_vm7 }
  0x71   : > { %1771 = vmatpush3.bf16.msk.msra.mxu1 %vm1770_vm14, %v1990_v32  ;;  %1772 = vmatprep.subr.bf16.mxu0 %v1987_v1  ;;  %vm1095_vm14 = vcmp.eq.s32.totalorder %v1093_v40, %v2114_v24 }
  0x72   : > { %1778 = vmatprep.subr.bf16.mxu1 %v1987_v1  ;;  %vm1785_vm2 = vmpackc.low %vm1095_vm14, %vm1094_vm13 }
  0x73   : > { %1691 = vmatmul.mubr.msk.f32.vlgmr.msra.gmra.mrb[2].mxu0 %vm170_vm6, %v2147_v35 }
  0x74   : > { %1702 = vmatmul.mubr.msk.f32.vlgmr.msra.gmra.mrb[2].mxu1 %vm170_vm6, %v2147_v35  ;;  %1774 = vmatpush3.bf16.msk.msra.mxu0 %vm1773_vm4, %v1990_v32  ;;  %vm1096_vm4 = vcmp.eq.s32.totalorder %v1093_v40, %v2119_v26 }
  0x75   : > { %1780 = vmatpush3.bf16.msk.msra.mxu1 %vm1779_vm5, %v1990_v32  ;;  %1775 = vmatprep.subr.bf16.mxu0 %v1987_v1  ;;  %vm1097_vm5 = vcmp.eq.s32.totalorder %v1093_v40, %v2122_v27 }
  0x76   : > { %1781 = vmatprep.subr.bf16.mxu1 %v1987_v1  ;;  %1712 = vmatprep.mubr.msk.f32.mxu0 %vm1988_vm0, %v1989_v5  ;;  %vm1788_vm9 = vmpackc.low %vm1097_vm5, %vm1096_vm4 }
  0x77   : > { %1723 = vmatprep.mubr.msk.f32.mxu1 %vm1988_vm0, %v1989_v5 }
  0x78   : > { %1777 = vmatpush3.bf16.msk.msra.mxu0 %vm1776_vm11, %v1990_v32 }
  0x79   : > { %1783 = vmatpush3.bf16.msk.msra.mxu1 %vm1782_vm12, %v1990_v32  ;;  %1784 = vmatprep.subr.bf16.mxu0 %v1987_v1 }
  0x7a   : > { %1790 = vmatprep.subr.bf16.mxu1 %v1987_v1 }
  0x7b   : > { %1713 = vmatmul.mubr.msk.f32.vlgmr.msra.gmra.mrb[4].mxu0 %vm170_vm6, %v2147_v35 }
  0x7c   : > { %1724 = vmatmul.mubr.msk.f32.vlgmr.msra.gmra.mrb[4].mxu1 %vm170_vm6, %v2147_v35  ;;  %1786 = vmatpush3.bf16.msk.msra.mxu0 %vm1785_vm2, %v1990_v32 }
  0x7d   : > { %1792 = vmatpush3.bf16.msk.msra.mxu1 %vm1791_vm3, %v1990_v32  ;;  %1787 = vmatprep.subr.bf16.mxu0 %v1987_v1 }
  0x7e   : > { %1793 = vmatprep.subr.bf16.mxu1 %v1987_v1  ;;  %1734 = vmatprep.mubr.msk.f32.mxu0 %vm1988_vm0, %v1989_v5 }
  0x7f   : > { %1745 = vmatprep.mubr.msk.f32.mxu1 %vm1988_vm0, %v1989_v5  ;;  %vm1410_vm0 = vcmask 130048  }
  0x80   : > { %1789 = vmatpush3.bf16.msk.msra.mxu0 %vm1788_vm9, %v1990_v32 }
  0x81   : > { %1795 = vmatpush3.bf16.msk.msra.mxu1 %vm1794_vm10, %v1990_v32 }
  0x83   : > { %1735 = vmatmul.mubr.msk.f32.vlgmr.msra.gmra.mrb[6].mxu0 %vm170_vm6, %v2147_v35 }
  0x84   : > { %1746 = vmatmul.mubr.msk.f32.vlgmr.msra.gmra.mrb[6].mxu1 %vm170_vm6, %v2147_v35 }
 0x13e   : > { %v240_v46 = vpop.f32.mrb[0].mxu0 }
 0x13f   : > { %v245_v47 = vcombine.high %v240_v46, %v240_v46  ;;  %v252_v48 = vrot.slane %v240_v46, %v2229_v45  ;;  %v396_v49 = vpop.f32.mrb[0].mxu1  ;;  %v1670_v50 = vpop.f32.mrb[1].mxu0 }
 0x140   : > { %v401_v51 = vcombine.high %v396_v49, %v396_v49  ;;  %v408_v52 = vrot.slane %v396_v49, %v2229_v45  ;;  %v1681_v53 = vpop.f32.mrb[1].mxu1 }
 0x141   : > { %v259_v54 = vrot.slane %v245_v47, %v2229_v45  ;;  %v260_v55 = vcombine.high %v252_v48, %v252_v48  ;;  %v268_v56 = vrot.slane %v252_v48, %v2229_v45  ;;  %1521 = vst.sshfl [vmem:[#allocation2] sm:$0x1 pattern:$0x73625140] %v252_v48 }
 0x142   : > { %v415_v57 = vrot.slane %v401_v51, %v2229_v45  ;;  %v416_v58 = vcombine.high %v408_v52, %v408_v52  ;;  %v424_v59 = vrot.slane %v408_v52, %v2229_v45  ;;  %1534 = vst.sshfl [vmem:[#allocation2 + $0x1] sm:$0x1 pattern:$0x73625140] %v408_v52 }
 0x143   : > { %v261_v60 = vcombine.high %v259_v54, %v259_v54  ;;  %v275_v61 = vrot.slane %v259_v54, %v2229_v45  ;;  %v282_v62 = vrot.slane %v260_v55, %v2229_v45  ;;  %v290_v63 = vcombine.high %v268_v56, %v268_v56  ;;  %1522 = vst.sshfl [vmem:[#allocation2 + $0x8] sm:$0x1 pattern:$0x73625140] %v260_v55 }
 0x144   : > { %1523 = vst.sshfl [vmem:[#allocation2 + $0x20] sm:$0x1 pattern:$0x73625140] %v259_v54  ;;  %v417_v0 = vcombine.high %v415_v57, %v415_v57  ;;  %v431_v1 = vrot.slane %v415_v57, %v2229_v45  ;;  %v438_v2 = vrot.slane %v416_v58, %v2229_v45  ;;  %v446_v3 = vcombine.high %v424_v59, %v424_v59 }
 0x145   : > { %1535 = vst.sshfl [vmem:[#allocation2 + $0x9] sm:$0x1 pattern:$0x73625140] %v416_v58  ;;  %v289_v4 = vrot.slane %v261_v60, %v2229_v45  ;;  %v291_v5 = vcombine.high %v275_v61, %v275_v61  ;;  %v292_v6 = vcombine.high %v282_v62, %v282_v62  ;;  %304 = vst [vmem:[#allocation2 + $0x10] sm:$0x1] %v290_v63 }
 0x146   : > { %1536 = vst.sshfl [vmem:[#allocation2 + $0x21] sm:$0x1 pattern:$0x73625140] %v415_v57  ;;  %v445_v7 = vrot.slane %v417_v0, %v2229_v45  ;;  %v447_v8 = vcombine.high %v431_v1, %v431_v1  ;;  %v448_v9 = vcombine.high %v438_v2, %v438_v2  ;;  %460 = vst [vmem:[#allocation2 + $0x11] sm:$0x1] %v446_v3 }
 0x147   : > { %1524 = vst.sshfl [vmem:[#allocation2 + $0x28] sm:$0x1 pattern:$0x73625140] %v261_v60  ;;  %v552_v10 = vpop.f32.mrb[2].mxu0  ;;  %v293_v11 = vcombine.high %v289_v4, %v289_v4  ;;  %v708_v14 = vpop.f32.mrb[2].mxu1 }
 0x148   : > { %1537 = vst.sshfl [vmem:[#allocation2 + $0x29] sm:$0x1 pattern:$0x73625140] %v417_v0  ;;  %305 = vst [vmem:[#allocation2 + $0x18] sm:$0x1] %v292_v6  ;;  %v557_v12 = vcombine.high %v552_v10, %v552_v10  ;;  %v564_v13 = vrot.slane %v552_v10, %v2229_v45  ;;  %v449_v16 = vcombine.high %v445_v7, %v445_v7 }
 0x149   : > { %308 = vst [vmem:[#allocation2 + $0x30] sm:$0x1] %v291_v5  ;;  %v1692_v15 = vpop.f32.mrb[3].mxu0  ;;  %461 = vst [vmem:[#allocation2 + $0x19] sm:$0x1] %v448_v9  ;;  %v713_v17 = vcombine.high %v708_v14, %v708_v14  ;;  %v720_v18 = vrot.slane %v708_v14, %v2229_v45  ;;  %v1703_v19 = vpop.f32.mrb[3].mxu1 }
 0x14a   : > { %464 = vst [vmem:[#allocation2 + $0x31] sm:$0x1] %v447_v8  ;;  %309 = vst [vmem:[#allocation2 + $0x38] sm:$0x1] %v293_v11  ;;  %v571_v20 = vrot.slane %v557_v12, %v2229_v45  ;;  %v572_v21 = vcombine.high %v564_v13, %v564_v13  ;;  %v580_v22 = vrot.slane %v564_v13, %v2229_v45 }
 0x14b   : > { %1547 = vst.sshfl [vmem:[#allocation2 + $0x2] sm:$0x1 pattern:$0x73625140] %v564_v13  ;;  %465 = vst [vmem:[#allocation2 + $0x39] sm:$0x1] %v449_v16  ;;  %v727_v23 = vrot.slane %v713_v17, %v2229_v45  ;;  %v728_v24 = vcombine.high %v720_v18, %v720_v18  ;;  %v736_v25 = vrot.slane %v720_v18, %v2229_v45 }
 0x14c   : > { %1560 = vst.sshfl [vmem:[#allocation2 + $0x3] sm:$0x1 pattern:$0x73625140] %v720_v18  ;;  %v573_v26 = vcombine.high %v571_v20, %v571_v20  ;;  %v587_v27 = vrot.slane %v571_v20, %v2229_v45  ;;  %v594_v28 = vrot.slane %v572_v21, %v2229_v45  ;;  %v602_v29 = vcombine.high %v580_v22, %v580_v22 }
 0x14d   : > { %1548 = vst.sshfl [vmem:[#allocation2 + $0xa] sm:$0x1 pattern:$0x73625140] %v572_v21  ;;  %v729_v30 = vcombine.high %v727_v23, %v727_v23  ;;  %v743_v31 = vrot.slane %v727_v23, %v2229_v45  ;;  %v750_v32 = vrot.slane %v728_v24, %v2229_v45  ;;  %v758_v33 = vcombine.high %v736_v25, %v736_v25 }
 0x14e   : > { %1549 = vst.sshfl [vmem:[#allocation2 + $0x22] sm:$0x1 pattern:$0x73625140] %v571_v20  ;;  %v601_v34 = vrot.slane %v573_v26, %v2229_v45  ;;  %v603_v35 = vcombine.high %v587_v27, %v587_v27  ;;  %v604_v36 = vcombine.high %v594_v28, %v594_v28  ;;  %616 = vst [vmem:[#allocation2 + $0x12] sm:$0x1] %v602_v29 }
 0x14f   : > { %1561 = vst.sshfl [vmem:[#allocation2 + $0xb] sm:$0x1 pattern:$0x73625140] %v728_v24  ;;  %v757_v37 = vrot.slane %v729_v30, %v2229_v45  ;;  %v759_v38 = vcombine.high %v743_v31, %v743_v31  ;;  %v760_v39 = vcombine.high %v750_v32, %v750_v32  ;;  %772 = vst [vmem:[#allocation2 + $0x13] sm:$0x1] %v758_v33 }
 0x150   : > { %1562 = vst.sshfl [vmem:[#allocation2 + $0x23] sm:$0x1 pattern:$0x73625140] %v727_v23  ;;  %v864_v40 = vpop.f32.mrb[4].mxu0  ;;  %v605_v41 = vcombine.high %v601_v34, %v601_v34  ;;  %v1020_v44 = vpop.f32.mrb[4].mxu1 }
 0x151   : > { %1550 = vst.sshfl [vmem:[#allocation2 + $0x2a] sm:$0x1 pattern:$0x73625140] %v573_v26  ;;  %617 = vst [vmem:[#allocation2 + $0x1a] sm:$0x1] %v604_v36  ;;  %v869_v42 = vcombine.high %v864_v40, %v864_v40  ;;  %v876_v43 = vrot.slane %v864_v40, %v2229_v45  ;;  %v761_v47 = vcombine.high %v757_v37, %v757_v37 }
 0x152   : > { %1563 = vst.sshfl [vmem:[#allocation2 + $0x2b] sm:$0x1 pattern:$0x73625140] %v729_v30  ;;  %620 = vst [vmem:[#allocation2 + $0x32] sm:$0x1] %v603_v35  ;;  %v1025_v48 = vcombine.high %v1020_v44, %v1020_v44  ;;  %v1032_v49 = vrot.slane %v1020_v44, %v2229_v45 }
 0x153   : > { %v1714_v46 = vpop.f32.mrb[5].mxu0  ;;  %773 = vst [vmem:[#allocation2 + $0x1b] sm:$0x1] %v760_v39  ;;  %776 = vst [vmem:[#allocation2 + $0x33] sm:$0x1] %v759_v38  ;;  %v1725_v50 = vpop.f32.mrb[5].mxu1  ;;  %v883_v51 = vrot.slane %v869_v42, %v2229_v45  ;;  %v884_v52 = vcombine.high %v876_v43, %v876_v43  ;;  %v892_v53 = vrot.slane %v876_v43, %v2229_v45 }
 0x154   : > { %621 = vst [vmem:[#allocation2 + $0x3a] sm:$0x1] %v605_v41  ;;  %1573 = vst.sshfl [vmem:[#allocation2 + $0x4] sm:$0x1 pattern:$0x73625140] %v876_v43  ;;  %v1039_v54 = vrot.slane %v1025_v48, %v2229_v45  ;;  %v1040_v55 = vcombine.high %v1032_v49, %v1032_v49  ;;  %v1048_v56 = vrot.slane %v1032_v49, %v2229_v45 }
 0x155   : > { %777 = vst [vmem:[#allocation2 + $0x3b] sm:$0x1] %v761_v47  ;;  %1586 = vst.sshfl [vmem:[#allocation2 + $0x5] sm:$0x1 pattern:$0x73625140] %v1032_v49  ;;  %v885_v57 = vcombine.high %v883_v51, %v883_v51  ;;  %v899_v58 = vrot.slane %v883_v51, %v2229_v45  ;;  %v906_v59 = vrot.slane %v884_v52, %v2229_v45 }
 0x156   : > { %v914_v60 = vcombine.high %v892_v53, %v892_v53  ;;  %1574 = vst.sshfl [vmem:[#allocation2 + $0xc] sm:$0x1 pattern:$0x73625140] %v884_v52  ;;  %v1041_v61 = vcombine.high %v1039_v54, %v1039_v54  ;;  %v1055_v62 = vrot.slane %v1039_v54, %v2229_v45  ;;  %v1062_v63 = vrot.slane %v1040_v55, %v2229_v45  ;;  %v1176_v7 = vpop.f32.mrb[6].mxu0 }
 0x157   : > { %1575 = vst.sshfl [vmem:[#allocation2 + $0x24] sm:$0x1 pattern:$0x73625140] %v883_v51  ;;  %v1070_v0 = vcombine.high %v1048_v56, %v1048_v56  ;;  %v913_v1 = vrot.slane %v885_v57, %v2229_v45  ;;  %v915_v2 = vcombine.high %v899_v58, %v899_v58  ;;  %v916_v3 = vcombine.high %v906_v59, %v906_v59  ;;  %v1332_v11 = vpop.f32.mrb[6].mxu1  ;;  %v1736_v12 = vpop.f32.mrb[7].mxu0 }
 0x158   : > { %1587 = vst.sshfl [vmem:[#allocation2 + $0xd] sm:$0x1 pattern:$0x73625140] %v1040_v55  ;;  %928 = vst [vmem:[#allocation2 + $0x14] sm:$0x1] %v914_v60  ;;  %v1069_v4 = vrot.slane %v1041_v61, %v2229_v45  ;;  %v1071_v5 = vcombine.high %v1055_v62, %v1055_v62  ;;  %v1072_v6 = vcombine.high %v1062_v63, %v1062_v63 }
 0x159   : > { %1588 = vst.sshfl [vmem:[#allocation2 + $0x25] sm:$0x1 pattern:$0x73625140] %v1039_v54  ;;  %1084 = vst [vmem:[#allocation2 + $0x15] sm:$0x1] %v1070_v0  ;;  %v917_v8 = vcombine.high %v913_v1, %v913_v1  ;;  %v1181_v9 = vcombine.high %v1176_v7, %v1176_v7  ;;  %v1188_v10 = vrot.slane %v1176_v7, %v2229_v45 }
 0x15a   : > { %1576 = vst.sshfl [vmem:[#allocation2 + $0x2c] sm:$0x1 pattern:$0x73625140] %v885_v57  ;;  %929 = vst [vmem:[#allocation2 + $0x1c] sm:$0x1] %v916_v3  ;;  %v1073_v13 = vcombine.high %v1069_v4, %v1069_v4  ;;  %v1337_v14 = vcombine.high %v1332_v11, %v1332_v11  ;;  %v1344_v15 = vrot.slane %v1332_v11, %v2229_v45 }
 0x15b   : > { %1589 = vst.sshfl [vmem:[#allocation2 + $0x2d] sm:$0x1 pattern:$0x73625140] %v1041_v61  ;;  %932 = vst [vmem:[#allocation2 + $0x34] sm:$0x1] %v915_v2  ;;  %v1195_v17 = vrot.slane %v1181_v9, %v2229_v45  ;;  %v1196_v18 = vcombine.high %v1188_v10, %v1188_v10  ;;  %v1204_v19 = vrot.slane %v1188_v10, %v2229_v45 }
 0x15c   : > { %1085 = vst [vmem:[#allocation2 + $0x1d] sm:$0x1] %v1072_v6  ;;  %1088 = vst [vmem:[#allocation2 + $0x35] sm:$0x1] %v1071_v5  ;;  %v1747_v16 = vpop.f32.mrb[7].mxu1  ;;  %v1351_v20 = vrot.slane %v1337_v14, %v2229_v45  ;;  %v1352_v21 = vcombine.high %v1344_v15, %v1344_v15  ;;  %v1360_v22 = vrot.slane %v1344_v15, %v2229_v45 }
 0x15d   : > { %933 = vst [vmem:[#allocation2 + $0x3c] sm:$0x1] %v917_v8  ;;  %1599 = vst.sshfl [vmem:[#allocation2 + $0x6] sm:$0x1 pattern:$0x73625140] %v1188_v10  ;;  %v1197_v23 = vcombine.high %v1195_v17, %v1195_v17  ;;  %v1211_v24 = vrot.slane %v1195_v17, %v2229_v45  ;;  %v1218_v25 = vrot.slane %v1196_v18, %v2229_v45 }
 0x15e   : > { %1089 = vst [vmem:[#allocation2 + $0x3d] sm:$0x1] %v1073_v13  ;;  %1612 = vst.sshfl [vmem:[#allocation2 + $0x7] sm:$0x1 pattern:$0x73625140] %v1344_v15  ;;  %v1226_v26 = vcombine.high %v1204_v19, %v1204_v19  ;;  %v1353_v27 = vcombine.high %v1351_v20, %v1351_v20  ;;  %v1367_v28 = vrot.slane %v1351_v20, %v2229_v45 }
 0x15f   : > { %1600 = vst.sshfl [vmem:[#allocation2 + $0xe] sm:$0x1 pattern:$0x73625140] %v1196_v18  ;;  %v1374_v29 = vrot.slane %v1352_v21, %v2229_v45  ;;  %v1382_v30 = vcombine.high %v1360_v22, %v1360_v22  ;;  %v1225_v31 = vrot.slane %v1197_v23, %v2229_v45  ;;  %v1227_v32 = vcombine.high %v1211_v24, %v1211_v24 }
 0x160   : > { %1601 = vst.sshfl [vmem:[#allocation2 + $0x26] sm:$0x1 pattern:$0x73625140] %v1195_v17  ;;  %v1228_v33 = vcombine.high %v1218_v25, %v1218_v25  ;;  %1240 = vst [vmem:[#allocation2 + $0x16] sm:$0x1] %v1226_v26  ;;  %v1381_v34 = vrot.slane %v1353_v27, %v2229_v45  ;;  %v1383_v35 = vcombine.high %v1367_v28, %v1367_v28 }
 0x161   : > { %1613 = vst.sshfl [vmem:[#allocation2 + $0xf] sm:$0x1 pattern:$0x73625140] %v1352_v21  ;;  %v1384_v36 = vcombine.high %v1374_v29, %v1374_v29  ;;  %1396 = vst [vmem:[#allocation2 + $0x17] sm:$0x1] %v1382_v30  ;;  %v1229_v37 = vcombine.high %v1225_v31, %v1225_v31 }
 0x162   : > { %1614 = vst.sshfl [vmem:[#allocation2 + $0x27] sm:$0x1 pattern:$0x73625140] %v1351_v20  ;;  %1241 = vst [vmem:[#allocation2 + $0x1e] sm:$0x1] %v1228_v33  ;;  %v1385_v38 = vcombine.high %v1381_v34, %v1381_v34 }
 0x163   : > { %1602 = vst.sshfl [vmem:[#allocation2 + $0x2e] sm:$0x1 pattern:$0x73625140] %v1197_v23  ;;  %1244 = vst [vmem:[#allocation2 + $0x36] sm:$0x1] %v1227_v32 }
 0x164   : > { %1615 = vst.sshfl [vmem:[#allocation2 + $0x2f] sm:$0x1 pattern:$0x73625140] %v1353_v27  ;;  %1397 = vst [vmem:[#allocation2 + $0x1f] sm:$0x1] %v1384_v36 }
 0x165   : > { %1400 = vst [vmem:[#allocation2 + $0x37] sm:$0x1] %v1383_v35  ;;  %1245 = vst [vmem:[#allocation2 + $0x3e] sm:$0x1] %v1229_v37  ;;  %v1402_v39 = vld [vmem:[#allocation2] sm:$0xff] }
 0x166   : > { %1401 = vst [vmem:[#allocation2 + $0x3f] sm:$0x1] %v1385_v38  ;;  %1411 = vst.msk [vmem:[%s121_s17] sm:$0xff] %vm1410_vm0, %v1402_v39 }
 0x168   : > { %v1403_v40 = vld [vmem:[#allocation2 + $0x8] sm:$0xff]  ;;  %v1404_v41 = vld [vmem:[#allocation2 + $0x10] sm:$0xff] }
 0x169   : > { %v1406_v45 = vld [vmem:[#allocation2 + $0x20] sm:$0xff]  ;;  %1412 = vst.msk [vmem:[%s121_s17 + $0x8] sm:$0xff] %vm1410_vm0, %v1403_v40  ;;  %1413 = vst.msk [vmem:[%s121_s17 + $0x10] sm:$0xff] %vm1410_vm0, %v1404_v41 }
 0x16a   : > { %1415 = vst.msk [vmem:[%s121_s17 + $0x20] sm:$0xff] %vm1410_vm0, %v1406_v45 }
 0x16b   : > { %v1407_v42 = vld [vmem:[#allocation2 + $0x28] sm:$0xff]  ;;  %v1405_v43 = vld [vmem:[#allocation2 + $0x18] sm:$0xff] }
 0x16c   : > { %1416 = vst.msk [vmem:[%s121_s17 + $0x28] sm:$0xff] %vm1410_vm0, %v1407_v42  ;;  %v1408_v44 = vld [vmem:[#allocation2 + $0x30] sm:$0xff]  ;;  %1414 = vst.msk [vmem:[%s121_s17 + $0x18] sm:$0xff] %vm1410_vm0, %v1405_v43 }
 0x16d   : > { %1417 = vst.msk [vmem:[%s121_s17 + $0x30] sm:$0xff] %vm1410_vm0, %v1408_v44  ;;  %v1409_v46 = vld [vmem:[#allocation2 + $0x38] sm:$0xff] }
 0x16e   : > { %1418 = vst.msk [vmem:[%s121_s17 + $0x38] sm:$0xff] %vm1410_vm0, %v1409_v46 }
 0x16f   : > { %1915 = shalt.err (!%p1912_p5)
}
 0x170   : > { %s1916_s29 = scalar_lea.hbm %s2291_s24, 1024  ;;  %s1920_s3 = scalar_lea.hbm %s2347_s1, 2048 }
 0x171   : > { %p1917_p6 = scmp.ne.s32.totalorder %s2291_s24, %s1916_s29  ;;  %p1921_p12 = scmp.lt.u32.totalorder %s2291_s24, %s2347_s1 }
 0x172   : > { %p1922_p0 = scmp.lt.u32.totalorder %s1920_s3, %s1916_s29  ;;  %p1924_p4 = scmp.lt.u32.totalorder %s1916_s29, %s2291_s24 }
 0x173   : > { %p1918_p7 = pnand %p1917_p6, %p2359_p8 }
 0x174   : > { %p1923_p2 = por %p1922_p0, %p1921_p12 }
 0x175   : > { %p1919_p9 = pneg %p1918_p7 }
 0x176   : > { %p1925_p10 = por %p1924_p4, %p1923_p2 }
 0x178   : > { %p1926_p11 = pnand %p1925_p10, %p1919_p9 }
 0x17a   : > { %1929 = shalt.err (!%p1926_p11)
}
 0x17b   : > { %s1993_s12 = smov 128   ;;  %s1994_s13 = smov 256  }
 0x17c   : > { %s1995_s15 = smov 8  }
 0x17d   : > { %1802 = dma.vmem_to_hbm [thread:$0]  (%p2359_p8), %s2293_s21, 1024, %s2291_s24, %s2300_s9, %s1993_s12, %s1994_s13, %s1995_s15  }
 0x17e PF: > { %p1814_p13 = scmp.ge.s32.totalorder %s1984_s11, 2  ;;  %s1448_s17 = sand.u32 1, %s1964_s6  }
 0x17f   : > { %p2360_p1 = scmp.ne.s32.totalorder %s2353_s18, 0  ;;  %s1449_s20 = scalar_lea.sflag [#allocation5], %s1448_s17 }
 0x181   : > { %p1809_p3 = pnand %p1814_p13, %p2360_p1 }
 0x183   : > { %1959 = dma.done.wait (!%p1809_p3), %s1449_s20, 1024  }
 0x184   : > { %1961 = vsyncadd (!%p1809_p3), %s1449_s20, 4294966272  ;;  %s15_s11 = sadd.s32 1, %s1984_s11   ;;  %s2361_s6 = smov %s1968_s7 }
 0x185   : > { %p12_p5 = scmp.ge.s32.totalorder %s15_s11, 4   ;;  %s2362_s7 = smov %s1972_s8 }
 0x186   : > { %s2363_s8 = smov %s2059_s19  ;;  %s2364_s9 = smov %s1980_s10 }
 0x187   : > { %s2365_s10 = smov %s2367_s14  ;;  %14 = sbr.rel (!%p12_p5) target bundleno = 5 (0x5), region = 61 }
 0x18e   :  { %1454 = vsyncpa [#allocation4], 1 }
 0x18f   :  { %1456 = vsyncpa [#allocation4 + $0x1], 1 }
 0x190   :  { %1457 = vsyncpa [#allocation5], 1 }
 0x191   :  { %1459 = vsyncpa [#allocation5 + $0x1], 1 }

</bundles_post_ra>
